<compile_context>
chip_gen: v5e
topology: v5e:2x2
jax: 0.10.0
libtpu: 0.0.40
codegen_flags: <defaults>
</compile_context>

<pallas_src>
import jax
import jax.numpy as jnp
from jax.experimental import pallas as pl
from jax.experimental.pallas import tpu as pltpu


def _round_up(x: int, m: int) -> int:
    return ((x + m - 1) // m) * m


def _make_kernel(tau: float, pad_rows: int, matmul_dtype=None):
    inv_tau = 1.0 / float(tau)

    def kernel(vj_ref, vq_ref, out_ref, m_sc, l_sc):
        j = pl.program_id(1)
        last_j = pl.num_programs(1) - 1

        @pl.when(j == 0)
        def _():
            m_sc[...] = jnp.full_like(m_sc, -jnp.inf)
            l_sc[...] = jnp.zeros_like(l_sc)

        # Fold 1/tau into the small (TQ, D) operand only; the key tile goes
        # straight from its ref into the MXU (no O(TJ*D) rescale per step).
        vq_scaled = vq_ref[...] * inv_tau                    # (TQ, D), input dtype
        vj = vj_ref[...]                                     # (TJ, D)
        if matmul_dtype is not None:
            vj = vj.astype(matmul_dtype)
            vq_scaled = vq_scaled.astype(matmul_dtype)

        # s[r, q] = <v_r, v_q> / tau for this (TJ, TQ) panel.  Contract dim 1
        # against dim 1 (no explicit transpose), f32 accumulation on the MXU.
        s = jax.lax.dot_general(
            vj, vq_scaled,
            dimension_numbers=(((1,), (1,)), ((), ())),
            preferred_element_type=jnp.float32,
        )                                                    # (TJ, TQ)

        # Online (flash-style) log-sum-exp over the key axis (sublanes).
        m_prev = m_sc[...]
        m_new = jnp.maximum(m_prev, jnp.max(s, axis=0, keepdims=True))   # (1, TQ)
        alpha = jnp.exp(m_prev - m_new)
        p_sum = jnp.sum(jnp.exp(s - m_new), axis=0, keepdims=True)       # (1, TQ)
        l_sc[...] = alpha * l_sc[...] + p_sum
        m_sc[...] = m_new

        @pl.when(j == last_j)
        def _():
            m_f = m_sc[...]
            l_f = l_sc[...]
            if pad_rows > 0:
                # Zero-padded key rows (only present in the last j tile) each
                # contributed exp(0 - m_final) to the column sum; subtract them
                # analytically instead of masking the whole panel.
                l_f = l_f - float(pad_rows) * jnp.exp(-m_f)
            # log numerator_q = ||v_q||^2 / tau, from the RAW tile in f32.
            vq32 = vq_ref[...].astype(jnp.float32)
            log_num = jnp.sum(vq32 * vq32, axis=1) * inv_tau             # (TQ,)
            # Per-row loss: log(den) - log(num).
            out_ref[...] = m_f + jnp.log(l_f) - log_num[None, :]

    return kernel


def instance_discrimination(features: jax.Array, tau: float, *,
                            tile_q: int = 256, tile_j: int = 512,
                            matmul_dtype=None) -> jax.Array:
    """Pallas TPU implementation of InstanceDiscrimination.forward.

    features: (N, D) float array.  Returns a scalar float32 loss.
    matmul_dtype: optionally cast gram-matmul operands (e.g. jnp.bfloat16) for
    ~3x MXU throughput on v6e/v7x when D is large; default keeps exact f32.
    """
    n, d = features.shape

    if n <= 128:
        # Single tile in both grid directions; block == (padded) full array.
        tile_q_eff = _round_up(n, 8)
        n_pad = tile_q_eff
        tile_j_eff = n_pad
    else:
        assert tile_q % 128 == 0, "tile_q must be a multiple of 128"
        tile_q_eff = tile_q
        n_pad = _round_up(n, tile_q_eff)
        n_q = n_pad // tile_q_eff
        # Key tile: a multiple of tile_q that divides n_pad, close to `tile_j`.
        k = max(1, min(max(tile_j, tile_q_eff) // tile_q_eff, n_q))
        while n_q % k:
            k -= 1
        tile_j_eff = k * tile_q_eff

    v = features if n_pad == n else jnp.pad(features, ((0, n_pad - n), (0, 0)))
    n_q_tiles = n_pad // tile_q_eff
    n_j_tiles = n_pad // tile_j_eff
    pad_rows = n_pad - n

    # Explicit scoped-VMEM budget from the tile footprint (+ headroom), instead
    # of relying on the 16/32 MiB defaults.  Kept under the v7x-safe 48 MiB.
    itemsize = jnp.dtype(features.dtype).itemsize
    mm_itemsize = itemsize if matmul_dtype is None else jnp.dtype(matmul_dtype).itemsize
    est = (2 * tile_j_eff * d * itemsize            # double-buffered key tile
           + 2 * tile_q_eff * d * itemsize          # query tile buffers
           + (tile_j_eff + tile_q_eff) * d * mm_itemsize   # optional cast copies
           + 3 * tile_j_eff * tile_q_eff * 4        # s / exp(s) panel temps
           + 16 * tile_q_eff * 4)                   # scratch + output blocks
    vmem_limit = int(min(max(2 * est + (4 << 20), 32 << 20), 48 << 20))

    per_row = pl.pallas_call(
        _make_kernel(tau, pad_rows, matmul_dtype),
        out_shape=jax.ShapeDtypeStruct((1, n_pad), jnp.float32),
        grid=(n_q_tiles, n_j_tiles),
        in_specs=[
            pl.BlockSpec((tile_j_eff, d), lambda i, j: (j, 0)),  # key tile (pipelined)
            pl.BlockSpec((tile_q_eff, d), lambda i, j: (i, 0)),  # query tile (resident over j)
        ],
        out_specs=pl.BlockSpec((1, tile_q_eff), lambda i, j: (0, i)),  # lane-dense losses
        scratch_shapes=[
            pltpu.VMEM((1, tile_q_eff), jnp.float32),   # running max
            pltpu.VMEM((1, tile_q_eff), jnp.float32),   # running sum
        ],
        compiler_params=pltpu.CompilerParams(
            dimension_semantics=("parallel", "arbitrary"),
            vmem_limit_bytes=vmem_limit,
        ),
    )(v, v)

    # Tiny final reduction over per-row losses (padded queries sliced off).
    return jnp.sum(per_row[0, :n])


def _reference(features, tau):
    v = features.astype(jnp.float32)
    numerator = jnp.exp(jnp.sum(v ** 2, axis=1) / tau)
    denominator = jnp.sum(jnp.exp((v @ v.T) / tau), axis=0)
    return -jnp.sum(jnp.log(numerator / denominator))


if __name__ == "__main__":
    tau = 0.5
    key1, key2 = jax.random.split(jax.random.PRNGKey(0))

    # Case 1: tiny batch -> single tile in both grid directions.
    n1, d1 = 8, 32
    f1 = 0.1 * jax.random.normal(key1, (n1, d1), dtype=jnp.float32)
    loss1 = instance_discrimination(f1, tau)
    jax.block_until_ready(loss1)
    ref1 = _reference(f1, tau)
    assert jnp.allclose(loss1, ref1, rtol=1e-5, atol=1e-4), (loss1, ref1)

    # Case 2: exercises the tiled online-LSE path (3 query tiles x 3 key tiles),
    # the pl.when init/finalize, and the analytic padded-row correction
    # (n_pad = 384, 84 zero-padded rows in the last key tile).
    n2, d2 = 300, 32
    f2 = 0.1 * jax.random.normal(key2, (n2, d2), dtype=jnp.float32)
    loss2 = instance_discrimination(f2, tau, tile_q=128, tile_j=128)
    jax.block_until_ready(loss2)
    ref2 = _reference(f2, tau)
    assert jnp.allclose(loss2, ref2, rtol=1e-5, atol=1e-4), (loss2, ref2)

    print("KERNEL_OK")
</pallas_src>

<mosaic_0001>
module attributes {stable_mosaic.version = 11 : i64} {
  func.func @kernel(%arg0: i32, %arg1: i32, %arg2: memref<8x32xf32, #tpu.memory_space<vmem>>, %arg3: memref<8x32xf32, #tpu.memory_space<vmem>>, %arg4: memref<1x8xf32, #tpu.memory_space<vmem>>, %arg5: memref<1x8xf32, #tpu.memory_space<vmem>>, %arg6: memref<1x8xf32, #tpu.memory_space<vmem>>) attributes {dimension_semantics = [#tpu.dimension_semantics<parallel>, #tpu.dimension_semantics<arbitrary>], iteration_bounds = array<i64: 1, 1>, scalar_prefetch = 0 : i64, scratch_operands = 2 : i64, tpu.core_type = #tpu.core_type<tc>, window_params = [{transform_indices = @transform_0, window_bounds = array<i64: 8, 32>}, {transform_indices = @transform_1, window_bounds = array<i64: 8, 32>}, {transform_indices = @transform_2, window_bounds = array<i64: 1, 8>}]} {
    %c0_i32 = arith.constant 0 : i32
    %0 = arith.cmpi eq, %arg1, %c0_i32 : i32
    %1 = arith.extui %0 : i1 to i32
    %c0_i32_0 = arith.constant 0 : i32
    %2 = arith.cmpi ne, %1, %c0_i32_0 : i32
    scf.if %2 {
      %cst_17 = arith.constant 0xFF800000 : f32
      %27 = vector.broadcast %cst_17 : f32 to vector<1x8xf32>
      %c0_18 = arith.constant 0 : index
      %c0_19 = arith.constant 0 : index
      %28 = vector.load %arg5[%c0_18, %c0_19] : memref<1x8xf32, #tpu.memory_space<vmem>>, vector<1x8xf32>
      tpu.vector_store %arg5[%c0_18, %c0_19], %27 {strides = array<i32>} : memref<1x8xf32, #tpu.memory_space<vmem>>, vector<1x8xf32>,
      %cst_20 = arith.constant 0.000000e+00 : f32
      %29 = vector.broadcast %cst_20 : f32 to vector<1x8xf32>
      %c0_21 = arith.constant 0 : index
      %c0_22 = arith.constant 0 : index
      %30 = vector.load %arg6[%c0_21, %c0_22] : memref<1x8xf32, #tpu.memory_space<vmem>>, vector<1x8xf32>
      tpu.vector_store %arg6[%c0_21, %c0_22], %29 {strides = array<i32>} : memref<1x8xf32, #tpu.memory_space<vmem>>, vector<1x8xf32>,
    } else {
    }
    %c0 = arith.constant 0 : index
    %c0_1 = arith.constant 0 : index
    %3 = vector.load %arg3[%c0, %c0_1] : memref<8x32xf32, #tpu.memory_space<vmem>>, vector<8x32xf32>
    %cst = arith.constant 2.000000e+00 : f32
    %4 = vector.broadcast %cst : f32 to vector<8x32xf32>
    %5 = arith.mulf %3, %4 : vector<8x32xf32>
    %c0_2 = arith.constant 0 : index
    %c0_3 = arith.constant 0 : index
    %6 = vector.load %arg2[%c0_2, %c0_3] : memref<8x32xf32, #tpu.memory_space<vmem>>, vector<8x32xf32>
    %cst_4 = arith.constant dense<0.000000e+00> : vector<8x8xf32>
    %7 = tpu.matmul %6, %5, %cst_4 {dimension_numbers = #tpu.dot_dimension_numbers<[1], [1], [0], [0], [0, 0, 1, 0], [], []>} : vector<8x32xf32>, vector<8x32xf32>, vector<8x8xf32> -> vector<8x8xf32>
    %c0_5 = arith.constant 0 : index
    %c0_6 = arith.constant 0 : index
    %8 = vector.load %arg5[%c0_5, %c0_6] : memref<1x8xf32, #tpu.memory_space<vmem>>, vector<1x8xf32>
    %cst_7 = arith.constant dense<0xFF800000> : vector<8xf32>
    %9 = vector.multi_reduction <maximumf>, %7, %cst_7 [0] : vector<8x8xf32> to vector<8xf32>
    %10 = vector.shape_cast %9 : vector<8xf32> to vector<1x8xf32>
    %11 = arith.maximumf %8, %10 : vector<1x8xf32>
    %12 = arith.subf %8, %11 : vector<1x8xf32>
    %13 = math.exp %12 : vector<1x8xf32>
    %14 = vector.broadcast %11 : vector<1x8xf32> to vector<8x8xf32>
    %15 = arith.subf %7, %14 : vector<8x8xf32>
    %16 = math.exp %15 : vector<8x8xf32>
    %cst_8 = arith.constant dense<0.000000e+00> : vector<8xf32>
    %17 = vector.multi_reduction <add>, %16, %cst_8 [0] : vector<8x8xf32> to vector<8xf32>
    %18 = vector.shape_cast %17 : vector<8xf32> to vector<1x8xf32>
    %c0_9 = arith.constant 0 : index
    %c0_10 = arith.constant 0 : index
    %19 = vector.load %arg6[%c0_9, %c0_10] : memref<1x8xf32, #tpu.memory_space<vmem>>, vector<1x8xf32>
    %20 = arith.mulf %13, %19 : vector<1x8xf32>
    %21 = arith.addf %20, %18 : vector<1x8xf32>
    %c0_11 = arith.constant 0 : index
    %c0_12 = arith.constant 0 : index
    %22 = vector.load %arg6[%c0_11, %c0_12] : memref<1x8xf32, #tpu.memory_space<vmem>>, vector<1x8xf32>
    tpu.vector_store %arg6[%c0_11, %c0_12], %21 {strides = array<i32>} : memref<1x8xf32, #tpu.memory_space<vmem>>, vector<1x8xf32>,
    %c0_13 = arith.constant 0 : index
    %c0_14 = arith.constant 0 : index
    %23 = vector.load %arg5[%c0_13, %c0_14] : memref<1x8xf32, #tpu.memory_space<vmem>>, vector<1x8xf32>
    tpu.vector_store %arg5[%c0_13, %c0_14], %11 {strides = array<i32>} : memref<1x8xf32, #tpu.memory_space<vmem>>, vector<1x8xf32>,
    %c0_i32_15 = arith.constant 0 : i32
    %24 = arith.cmpi eq, %arg1, %c0_i32_15 : i32
    %25 = arith.extui %24 : i1 to i32
    %c0_i32_16 = arith.constant 0 : i32
    %26 = arith.cmpi ne, %25, %c0_i32_16 : i32
    scf.if %26 {
      %c0_17 = arith.constant 0 : index
      %c0_18 = arith.constant 0 : index
      %27 = vector.load %arg5[%c0_17, %c0_18] : memref<1x8xf32, #tpu.memory_space<vmem>>, vector<1x8xf32>
      %c0_19 = arith.constant 0 : index
      %c0_20 = arith.constant 0 : index
      %28 = vector.load %arg6[%c0_19, %c0_20] : memref<1x8xf32, #tpu.memory_space<vmem>>, vector<1x8xf32>
      %c0_21 = arith.constant 0 : index
      %c0_22 = arith.constant 0 : index
      %29 = vector.load %arg3[%c0_21, %c0_22] : memref<8x32xf32, #tpu.memory_space<vmem>>, vector<8x32xf32>
      %30 = arith.mulf %29, %29 : vector<8x32xf32>
      %cst_23 = arith.constant dense<0.000000e+00> : vector<8xf32>
      %31 = vector.multi_reduction <add>, %30, %cst_23 [1] : vector<8x32xf32> to vector<8xf32>
      %cst_24 = arith.constant 2.000000e+00 : f32
      %32 = vector.broadcast %cst_24 : f32 to vector<8xf32>
      %33 = arith.mulf %31, %32 : vector<8xf32>
      %34 = math.log %28 : vector<1x8xf32>
      %35 = arith.addf %27, %34 : vector<1x8xf32>
      %36 = vector.shape_cast %33 : vector<8xf32> to vector<1x8xf32>
      %37 = arith.subf %35, %36 : vector<1x8xf32>
      %c0_25 = arith.constant 0 : index
      %c0_26 = arith.constant 0 : index
      %38 = vector.load %arg4[%c0_25, %c0_26] : memref<1x8xf32, #tpu.memory_space<vmem>>, vector<1x8xf32>
      tpu.vector_store %arg4[%c0_25, %c0_26], %37 {strides = array<i32>} : memref<1x8xf32, #tpu.memory_space<vmem>>, vector<1x8xf32>,
    } else {
    }
    return
  }
  func.func @transform_0(%arg0: i32, %arg1: i32) -> (i32, i32) {
    %c0_i32 = arith.constant 0 : i32
    %c0_i32_0 = arith.constant 0 : i32
    return %arg1, %c0_i32 : i32, i32
  }
  func.func @transform_1(%arg0: i32, %arg1: i32) -> (i32, i32) {
    %c0_i32 = arith.constant 0 : i32
    %c0_i32_0 = arith.constant 0 : i32
    return %arg0, %c0_i32 : i32, i32
  }
  func.func @transform_2(%arg0: i32, %arg1: i32) -> (i32, i32) {
    %c0_i32 = arith.constant 0 : i32
    %c0_i32_0 = arith.constant 0 : i32
    return %c0_i32, %arg0 : i32, i32
  }
}

</mosaic_0001>

<bundles_post_ra>
// kernel: tpu_custom_call.1
= control target key start
LH: loop header
LB: loop body
LE: loop exit
PB: predicated region body
PF: predicated region fallthrough
CT: control target
= control target key end

     0   :  { %7 = vsyncpa [#allocation5], 0  ;;  %s305_s0 = inlined_call_operand.hbm [shape: f32[8,32], index: 0, kind: input, shape index: {}]   ;;  %s306_s1 = inlined_call_operand.hbm [shape: f32[8,32], index: 1, kind: input, shape index: {}]   ;;  %s307_s2 = inlined_call_operand.hbm [shape: f32[1,8], index: 2, kind: output, shape index: {}]  }
   0x1   :  { %8 = vsyncpa [#allocation8], 0 }
   0x2   :  { %9 = vsyncpa [#allocation6], 0  ;;  %s15_s11 = sshll.u32 %s305_s0, 4  ;;  %s268_s12 = smov [#allocation4]   ;;  %s16_s11 = int_to_ptr.hbm [resolvable:$true] %s15_s11 }
   0x3   :  { %s17_s13 = sshll.u32 %s268_s12, 4  ;;  %s26_s16 = sshll.u32 %s306_s1, 4  ;;  %s18_s13 = int_to_ptr.vmem [resolvable:$true] %s17_s13  ;;  %s27_s16 = int_to_ptr.hbm [resolvable:$true] %s26_s16 }
   0x4   :  { %20 = dma.hbm_to_vmem [thread:$0]  %s16_s11, 128, %s18_s13, [#allocation5]  }
   0x5   :  { %s269_s17 = smov [#allocation7]  }
   0x6   :  { %s28_s18 = sshll.u32 %s269_s17, 4  ;;  %s29_s18 = int_to_ptr.vmem [resolvable:$true] %s28_s18 }
   0x7   :  { %31 = dma.hbm_to_vmem [thread:$0]  %s27_s16, 128, %s29_s18, [#allocation8]  }
   0x8   :  { %262 = dma.done.wait [#allocation5], 128  }
   0x9   :  { %263 = vsyncadd [#allocation5], 4294967168 }
   0xa   :  { %264 = dma.done.wait [#allocation8], 128  }
   0xb   :  { %265 = vsyncadd [#allocation8], 4294967168  ;;  %vm50_vm0 = vcmask 261120   ;;  %v114_v0 = vld [vmem:[#allocation7] sm:$0xff]  ;;  %v49_v4 = vld [vmem:[#allocation4] sm:$0xff]  ;;  %v270_v5 = vmov 0   ;;  %v151_v47 = vlaneseq }
   0xc   :  { %v115_v1 = vmul.f32 %v114_v0, %v114_v0  ;;  %v48_v2 = vmul.f32 2.0, %v114_v0  ;;  %183 = vset.pattern.permute.xlu0 %v270_v5  ;;  %vm44_vm1 = vcmask 57344   ;;  %v271_v6 = vmov -inf   ;;  %s273_s0 = smov [#allocation9]   ;;  %s164_s21 = sshll.u32 %s307_s2, 4  ;;  %s165_s21 = int_to_ptr.hbm [resolvable:$true] %s164_s21 }
   0xd   :  { %45 = vst.msk [vmem:[#allocation2] sm:$0x1] %vm44_vm1, %v271_v6  ;;  %v272_v7 = vmov 0.0   ;;  %vm78_vm2 = vcmask 64512   ;;  %v152_v49 = vand.u32 127, %v151_v47  ;;  %s162_s1 = sshll.u32 %s273_s0, 4  ;;  %s163_s1 = int_to_ptr.vmem [resolvable:$true] %s162_s1 }
   0xe   :  { %v116_v3 = vsel %vm50_vm0, %v115_v1, 0.0  ;;  %175 = vmatpush.xpose.msk.msra.mxu0 %vm50_vm0, %v48_v2  ;;  %46 = vst.msk [vmem:[#allocation3] sm:$0x1] %vm44_vm1, %v272_v7 }
   0xf   :  { %117 = vadd.xlane.f32.xlu0 %v116_v3 }
  0x11   :  { %176 = vmatmul.msk.f32.vlgmr.msra.gmra.mxu0 %vm50_vm0, %v49_v4 }
  0x14   :  { %v77_v26 = vld [vmem:[#allocation2] sm:$0x1] }
  0x15   :  { %v103_v40 = vld [vmem:[#allocation3] sm:$0x1] }
  0x82   :  { %v118_v8 = vpop.xlane.xlu0 %117 }
  0x83   :  { %v119_v9 = vmul.f32 2.0, %v118_v8 }
  0x85   :  { %v124_v10 = vperm.slane %v119_v9, 0  ;;  %v125_v11 = vperm.slane %v119_v9, 1  ;;  %v126_v12 = vperm.slane %v119_v9, 2  ;;  %v127_v13 = vperm.slane %v119_v9, 3 }
  0x86   :  { %v128_v14 = vperm.slane %v119_v9, 4  ;;  %v129_v15 = vperm.slane %v119_v9, 5  ;;  %v130_v16 = vperm.slane %v119_v9, 6  ;;  %v131_v17 = vperm.slane %v119_v9, 7 }
  0x87   :  { %132 = vst [vmem:[#allocation1] ss:$9 sm:$0xff] %v124_v10 }
  0x88   :  { %134 = vst [vmem:[#allocation1 + $0x1] ss:$9 sm:$0xff] %v125_v11 }
  0x89   :  { %136 = vst [vmem:[#allocation1 + $0x2] ss:$9 sm:$0xff] %v126_v12 }
  0x8a   :  { %138 = vst [vmem:[#allocation1 + $0x3] ss:$9 sm:$0xff] %v127_v13 }
  0x8b   :  { %140 = vst [vmem:[#allocation1 + $0x4] ss:$9 sm:$0xff] %v128_v14 }
  0x8c   :  { %142 = vst [vmem:[#allocation1 + $0x5] ss:$9 sm:$0xff] %v129_v15 }
  0x8d   :  { %144 = vst [vmem:[#allocation1 + $0x6] ss:$9 sm:$0xff] %v130_v16 }
  0x8e   :  { %146 = vst [vmem:[#allocation1 + $0x7] ss:$9 sm:$0xff] %v131_v17  ;;  %v74_v18 = vpop.f32.mrf.mxu0 }
  0x8f   :  { %v79_v19 = vsel %vm78_vm2, %v74_v18, -inf }
  0x90   :  { %v80_v20 = vrot.slane %v79_v19, 4 }
  0x92   :  { %v81_v21 = vmax.f32 %v79_v19, %v80_v20 }
  0x94   :  { %v82_v22 = vrot.slane %v81_v21, 2 }
  0x95   :  { %v147_v23 = vld [vmem:[#allocation1] sm:$0xff] }
  0x96   :  { %149 = vperm.xlu0 %183, %v147_v23   ;;  %v83_v24 = vmax.f32 %v81_v21, %v82_v22 }
  0x98   :  { %v84_v25 = vrot.slane %v83_v24, 1 }
  0x9a   :  { %v85_v27 = vmax.f32 %v83_v24, %v84_v25 }
  0x9c   :  { %v86_v28 = vmax.f32 %v77_v26, %v85_v27 }
  0x9e   :  { %v91_v29 = vperm.slane %v86_v28, 0  ;;  %108 = vst.msk [vmem:[#allocation2] sm:$0x1] %vm44_vm1, %v86_v28  ;;  %v87_v32 = vsub.f32 %v77_v26, %v86_v28 }
  0xa0   :  { %v93_v30 = vsub.f32 %v74_v18, %v91_v29  ;;  %v88_v33 = vmul.f32 1.442695, %v87_v32 }
  0xa2   :  { %v94_v31 = vmul.f32 1.442695, %v93_v30 }
  0xa4   :  { %184 = vpow2.f32 %v94_v31 }
  0xa5   :  { %186 = vpow2.f32 %v88_v33  ;;  %v112_v51 = vld [vmem:[#allocation2] sm:$0x1] }
  0xaa   :  { %v185_v34 = vpop.eup %184 }
  0xab   :  { %v96_v35 = vsel %vm78_vm2, %v185_v34, 0.0  ;;  %v187_v39 = vpop.eup %186 }
  0xac   :  { %v97_v36 = vrot.slane %v96_v35, 4  ;;  %v104_v43 = vmul.f32 %v187_v39, %v103_v40 }
  0xae   :  { %v98_v37 = vadd.f32 %v97_v36, %v96_v35 }
  0xb0   :  { %v99_v38 = vrot.slane %v98_v37, 2 }
  0xb2   :  { %v100_v41 = vadd.f32 %v99_v38, %v98_v37 }
  0xb4   :  { %v101_v42 = vrot.slane %v100_v41, 1 }
  0xb6   :  { %v102_v44 = vadd.f32 %v101_v42, %v100_v41 }
  0xb8   :  { %v105_v45 = vadd.f32 %v104_v43, %v102_v44 }
  0xba   :  { %107 = vst.msk [vmem:[#allocation3] sm:$0x1] %vm44_vm1, %v105_v45 }
  0xc1   :  { %v113_v46 = vld [vmem:[#allocation3] sm:$0x1] }
  0xc2   :  { %188 = vlog2.f32 %v113_v46 }
  0xc8   :  { %v189_v48 = vpop.eup %188 }
  0xc9   :  { %v121_v50 = vmul.f32 0.6931472, %v189_v48 }
  0xcb   :  { %v122_v53 = vadd.f32 %v121_v50, %v112_v51 }
 0x108   :  { %v150_v52 = vpop.permute.xlu0 %149 }
 0x109   :  { %v153_v54 = vperm.slane %v150_v52, %v152_v49 }
 0x10b   :  { %v155_v55 = vsub.f32 %v122_v53, %v153_v54 }
 0x10d   :  { %156 = vst.msk [vmem:[#allocation9] sm:$0x1] %vm44_vm1, %v155_v55 }
 0x10e   :  { %167 = dma.vmem_to_hbm [thread:$0]  %s163_s1, 16, %s165_s21, [#allocation6]  }
 0x10f   :  { %266 = dma.done.wait [#allocation6], 16  }
 0x110   :  { %267 = vsyncadd [#allocation6], 4294967280 }
 0x111   :  { %172 = vsyncpa [#allocation5], 1 }
 0x112   :  { %173 = vsyncpa [#allocation8], 1 }
 0x113   :  { %174 = vsyncpa [#allocation6], 1 }

</bundles_post_ra>
